<compile_context>
chip_gen: v6e
topology: v6e:2x2x1
jax: 0.10.0
libtpu: 0.0.40
codegen_flags: <defaults>
</compile_context>

<pallas_src>
import functools

import jax
import jax.numpy as jnp
from jax.experimental import pallas as pl
from jax.experimental.pallas import tpu as pltpu


def _lstm_kernel(x_ref, wih_ref, whh_ref, wout_ref, small_ref,
                 out_ref, hn_ref, cn_ref,
                 xwb_ref):
    seq_len = x_ref.shape[0]
    hidden = hn_ref.shape[-1]

    # Coalesced tiny operands: row0 = h0 (lane-padded), row1 = c0 (lane-padded),
    # row2 = packed gate bias (i/f/o pre-scaled by 0.5), row3 = padded out bias.
    h = small_ref[0:1, :hidden]                     # (1, H)
    c = small_ref[1:2, :hidden]                     # (1, H)
    b = small_ref[2:3, :]                           # (1, 4H)

    # ---- hoisted input projection -> VMEM scratch ---------------------------
    # One (seq, in) x (in, 4H) matmul; the recurrence then reads row t with a
    # cheap vld instead of a sublane extraction from a live vreg value.
    xwb_ref[...] = (jnp.dot(x_ref[...], wih_ref[...],
                            preferred_element_type=jnp.float32) + b)

    whh = whh_ref[...]                              # (H, 4H), vreg-resident

    def step(h, c, xwb_row):
        gates = (jnp.dot(h, whh, preferred_element_type=jnp.float32)
                 + xwb_row)                         # (1, 4H), order i,f,o,g
        # i/f/o weight columns are pre-scaled by 0.5, so one full-width tanh
        # gives tanh(x/2) there (sigmoid = 0.5*t + 0.5) and tanh(g) on the
        # last H lanes: a single EUP push per step for all four gates.
        t_all = jnp.tanh(gates)
        sig = 0.5 * t_all + 0.5                     # full-vreg VPU madd
        i_g = sig[:, :hidden]
        f_g = sig[:, hidden:2 * hidden]
        o_g = sig[:, 2 * hidden:3 * hidden]
        g_g = t_all[:, 3 * hidden:]
        c_new = f_g * c + i_g * g_g
        h_new = o_g * jnp.tanh(c_new)
        return h_new, c_new

    if seq_len <= 16:
        # Small static sequences: full unroll (cross-step scheduler visibility,
        # all slices static).
        for t in range(seq_len):
            h, c = step(h, c, xwb_ref[t:t + 1, :])
    else:
        # Long sequences: bound live ranges / code size with a rolled loop.
        def body(t, carry):
            hh, cc = carry
            return step(hh, cc, xwb_ref[pl.ds(t, 1), :])
        h, c = jax.lax.fori_loop(0, seq_len, body, (h, c), unroll=4)

    # ---- lane-dense epilogue: Linear + LogSoftmax (runs once) ---------------
    # wout is zero-padded to (H, 4H); bout pad lanes are -1e30 so they vanish
    # from the max / sum and the store is a full-lane unmasked vst.
    bout = small_ref[3:4, :]                        # (1, 4H)
    logits = (jnp.dot(h, wout_ref[...], preferred_element_type=jnp.float32)
              + bout)                               # (1, 4H)
    m = jnp.max(logits, axis=-1, keepdims=True)
    shifted = logits - m
    lse = jnp.log(jnp.sum(jnp.exp(shifted), axis=-1, keepdims=True))
    out_ref[...] = shifted - lse
    hn_ref[...] = h
    cn_ref[...] = c


@functools.partial(jax.jit, static_argnames=("output_size",))
def lstm_forward(x, h0, c0, w_ih_packed, w_hh_packed, b_packed,
                 w_out_padded, b_out_padded, *, output_size):
    """x: (seq, 1, in); h0/c0: (1, 1, H).
    Packed weights: W_ih (in, 4H), W_hh (H, 4H), bias (1, 4H) with i/f/o
    pre-scaled by 0.5; W_out (H, 4H) zero-padded, b_out (1, 4H) -1e30-padded."""
    seq_len, _, input_size = x.shape
    hidden = h0.shape[-1]
    lanes = w_out_padded.shape[-1]                  # == 4 * hidden

    x2d = x.reshape(seq_len, input_size)

    # Coalesce the four sub-KiB operands into ONE (4, lanes) input -> one DMA.
    h_row = jnp.zeros((1, lanes), jnp.float32).at[:, :hidden].set(
        h0.reshape(1, hidden))
    c_row = jnp.zeros((1, lanes), jnp.float32).at[:, :hidden].set(
        c0.reshape(1, hidden))
    small = jnp.concatenate([h_row, c_row, b_packed, b_out_padded], axis=0)

    out_shapes = (
        jax.ShapeDtypeStruct((1, lanes), jnp.float32),   # padded log-softmax
        jax.ShapeDtypeStruct((1, hidden), jnp.float32),  # hn
        jax.ShapeDtypeStruct((1, hidden), jnp.float32),  # cn
    )

    # Single invocation, no grid: the whole ~40 KiB problem is brought into
    # VMEM by the default full-array BlockSpecs; the kernel is latency-bound
    # on the serial h->h chain, so no tiling/pipelining is added.
    out_pad, hn, cn = pl.pallas_call(
        _lstm_kernel,
        out_shape=out_shapes,
        scratch_shapes=[pltpu.VMEM((seq_len, 4 * hidden), jnp.float32)],
    )(x2d, w_ih_packed, w_hh_packed, w_out_padded, small)

    return (out_pad[:, :output_size],
            hn.reshape(1, 1, hidden),
            cn.reshape(1, 1, hidden))


def _pack_gate_matrix(w_pt, hidden):
    """PyTorch (4H, D) weight in gate order (i, f, g, o) -> lane-packed (D, 4H)
    in kernel gate order (i, f, o, g), with i/f/o columns pre-scaled by 0.5
    for the single-tanh sigmoid trick (sigmoid(x) = 0.5*tanh(x/2) + 0.5)."""
    g = w_pt.reshape(4, hidden, -1)                        # (gate, out, in)
    g = jnp.stack([0.5 * g[0], 0.5 * g[1], 0.5 * g[3], g[2]])   # i, f, o, g
    return jnp.transpose(g, (2, 0, 1)).reshape(w_pt.shape[1], 4 * hidden)


def _pack_gate_bias(b_ih, b_hh, hidden):
    b = (b_ih + b_hh).reshape(4, hidden)                   # i, f, g, o
    b = jnp.stack([0.5 * b[0], 0.5 * b[1], 0.5 * b[3], b[2]])    # i, f, o, g
    return b.reshape(1, 4 * hidden)


def _pack_output(w_out_pt, b_out_pt, lanes):
    """nn.Linear (out, H) / (out,) -> lane-dense (H, lanes) / (1, lanes).
    Padded bias lanes get -1e30 so they drop out of the log-softmax."""
    output_size, hidden = w_out_pt.shape
    w = jnp.zeros((hidden, lanes), jnp.float32).at[:, :output_size].set(
        w_out_pt.T)
    b = jnp.full((1, lanes), -1e30, jnp.float32).at[:, :output_size].set(
        b_out_pt)
    return w, b


def _reference(x, h0, c0, w_ih_pt, w_hh_pt, b_ih, b_hh, w_out_pt, b_out_pt):
    """Pure-JAX reference in raw PyTorch layout (independent of kernel packing)."""
    hidden = h0.shape[-1]
    wi = [w_ih_pt[g * hidden:(g + 1) * hidden] for g in range(4)]   # i,f,g,o
    wh = [w_hh_pt[g * hidden:(g + 1) * hidden] for g in range(4)]
    bb = [(b_ih + b_hh)[g * hidden:(g + 1) * hidden] for g in range(4)]

    def step(carry, xt):
        h, c = carry
        pre = [xt @ wi[g].T + h @ wh[g].T + bb[g] for g in range(4)]
        i = jax.nn.sigmoid(pre[0])
        f = jax.nn.sigmoid(pre[1])
        g = jnp.tanh(pre[2])
        o = jax.nn.sigmoid(pre[3])
        c = f * c + i * g
        h = o * jnp.tanh(c)
        return (h, c), h

    (h, c), _ = jax.lax.scan(step, (h0[0], c0[0]), x)   # x: (seq, 1, in)
    logits = h @ w_out_pt.T + b_out_pt
    return jax.nn.log_softmax(logits, axis=-1), h[None], c[None]


if __name__ == "__main__":
    seq_len = 8
    input_size = 32
    hidden = 32
    output_size = 18

    key = jax.random.PRNGKey(0)
    keys = jax.random.split(key, 8)
    bound = 1.0 / jnp.sqrt(hidden)

    # Deterministic "synthetic checkpoint": PyTorch-style U(-1/sqrt(H), 1/sqrt(H)).
    x = jax.random.normal(keys[0], (seq_len, 1, input_size), jnp.float32)
    h0 = jnp.zeros((1, 1, hidden), jnp.float32)
    c0 = jnp.zeros((1, 1, hidden), jnp.float32)

    # nn.LSTM params: weight_ih (4H, in), weight_hh (4H, H), biases (4H,) each.
    w_ih_pt = jax.random.uniform(keys[1], (4 * hidden, input_size),
                                 jnp.float32, -bound, bound)
    w_hh_pt = jax.random.uniform(keys[2], (4 * hidden, hidden),
                                 jnp.float32, -bound, bound)
    b_ih = jax.random.uniform(keys[3], (4 * hidden,), jnp.float32, -bound, bound)
    b_hh = jax.random.uniform(keys[4], (4 * hidden,), jnp.float32, -bound, bound)

    # nn.Linear(hidden, output_size)
    w_out_pt = jax.random.uniform(keys[5], (output_size, hidden),
                                  jnp.float32, -bound, bound)
    b_out_pt = jax.random.uniform(keys[6], (output_size,),
                                  jnp.float32, -bound, bound)

    lanes = 4 * hidden
    assert output_size <= lanes, "epilogue padding assumes output_size <= 4*hidden"

    # Kernel-side packing: lane-packed gates (i, f, o, g), i/f/o pre-scaled by
    # 0.5; lane-dense padded output projection.
    w_ih_packed = _pack_gate_matrix(w_ih_pt, hidden)      # (in, 4H)
    w_hh_packed = _pack_gate_matrix(w_hh_pt, hidden)      # (H, 4H)
    b_packed = _pack_gate_bias(b_ih, b_hh, hidden)        # (1, 4H)
    w_out_pad, b_out_pad = _pack_output(w_out_pt, b_out_pt, lanes)

    out, hn, cn = lstm_forward(x, h0, c0, w_ih_packed, w_hh_packed, b_packed,
                               w_out_pad, b_out_pad, output_size=output_size)
    jax.block_until_ready((out, hn, cn))

    ref_out, ref_hn, ref_cn = _reference(x, h0, c0, w_ih_pt, w_hh_pt,
                                         b_ih, b_hh, w_out_pt, b_out_pt)
    # Tolerance slightly loosened vs 1e-5: sigmoid is now computed as
    # 0.5*tanh(x/2)+0.5 (mathematically exact, rounding differs by a few ulps).
    assert jnp.allclose(out, ref_out, atol=1e-4, rtol=1e-4)
    assert jnp.allclose(hn, ref_hn, atol=1e-4, rtol=1e-4)
    assert jnp.allclose(cn, ref_cn, atol=1e-4, rtol=1e-4)

    print("KERNEL_OK")
</pallas_src>

<mosaic_0001>
module attributes {stable_mosaic.version = 11 : i64} {
  func.func @_lstm_kernel(%arg0: memref<8x32xf32, #tpu.memory_space<vmem>>, %arg1: memref<32x128xf32, #tpu.memory_space<vmem>>, %arg2: memref<32x128xf32, #tpu.memory_space<vmem>>, %arg3: memref<32x128xf32, #tpu.memory_space<vmem>>, %arg4: memref<4x128xf32, #tpu.memory_space<vmem>>, %arg5: memref<1x128xf32, #tpu.memory_space<vmem>>, %arg6: memref<1x32xf32, #tpu.memory_space<vmem>>, %arg7: memref<1x32xf32, #tpu.memory_space<vmem>>, %arg8: memref<8x128xf32, #tpu.memory_space<vmem>>) attributes {dimension_semantics = [], scalar_prefetch = 0 : i64, scratch_operands = 1 : i64, tpu.core_type = #tpu.core_type<tc>} {
    %c0 = arith.constant 0 : index
    %c0_0 = arith.constant 0 : index
    %0 = vector.load %arg4[%c0, %c0_0] : memref<4x128xf32, #tpu.memory_space<vmem>>, vector<1x32xf32>
    %c1 = arith.constant 1 : index
    %c0_1 = arith.constant 0 : index
    %1 = vector.load %arg4[%c1, %c0_1] : memref<4x128xf32, #tpu.memory_space<vmem>>, vector<1x32xf32>
    %c2 = arith.constant 2 : index
    %c0_2 = arith.constant 0 : index
    %2 = vector.load %arg4[%c2, %c0_2] : memref<4x128xf32, #tpu.memory_space<vmem>>, vector<1x128xf32>
    %c0_3 = arith.constant 0 : index
    %c0_4 = arith.constant 0 : index
    %3 = vector.load %arg0[%c0_3, %c0_4] : memref<8x32xf32, #tpu.memory_space<vmem>>, vector<8x32xf32>
    %c0_5 = arith.constant 0 : index
    %c0_6 = arith.constant 0 : index
    %4 = vector.load %arg1[%c0_5, %c0_6] : memref<32x128xf32, #tpu.memory_space<vmem>>, vector<32x128xf32>
    %cst = arith.constant dense<0.000000e+00> : vector<8x128xf32>
    %5 = tpu.matmul %3, %4, %cst {dimension_numbers = #tpu.dot_dimension_numbers<[1], [0], [0], [1], [0, 0, 1, 1], [], []>} : vector<8x32xf32>, vector<32x128xf32>, vector<8x128xf32> -> vector<8x128xf32>
    %6 = vector.broadcast %2 : vector<1x128xf32> to vector<8x128xf32>
    %7 = arith.addf %5, %6 : vector<8x128xf32>
    %c0_7 = arith.constant 0 : index
    %c0_8 = arith.constant 0 : index
    %8 = vector.load %arg8[%c0_7, %c0_8] : memref<8x128xf32, #tpu.memory_space<vmem>>, vector<8x128xf32>
    tpu.vector_store %arg8[%c0_7, %c0_8], %7 {strides = array<i32>} : memref<8x128xf32, #tpu.memory_space<vmem>>, vector<8x128xf32>,
    %c0_9 = arith.constant 0 : index
    %c0_10 = arith.constant 0 : index
    %9 = vector.load %arg2[%c0_9, %c0_10] : memref<32x128xf32, #tpu.memory_space<vmem>>, vector<32x128xf32>
    %c0_11 = arith.constant 0 : index
    %c0_12 = arith.constant 0 : index
    %10 = vector.load %arg8[%c0_11, %c0_12] : memref<8x128xf32, #tpu.memory_space<vmem>>, vector<1x128xf32>
    %cst_13 = arith.constant dense<0.000000e+00> : vector<1x128xf32>
    %11 = tpu.matmul %0, %9, %cst_13 {dimension_numbers = #tpu.dot_dimension_numbers<[1], [0], [0], [1], [0, 0, 1, 1], [], []>} : vector<1x32xf32>, vector<32x128xf32>, vector<1x128xf32> -> vector<1x128xf32>
    %12 = arith.addf %11, %10 : vector<1x128xf32>
    %13 = math.tanh %12 : vector<1x128xf32>
    %cst_14 = arith.constant 5.000000e-01 : f32
    %14 = vector.broadcast %cst_14 : f32 to vector<1x128xf32>
    %15 = arith.mulf %14, %13 : vector<1x128xf32>
    %cst_15 = arith.constant 5.000000e-01 : f32
    %16 = vector.broadcast %cst_15 : f32 to vector<1x128xf32>
    %17 = arith.addf %15, %16 : vector<1x128xf32>
    %18 = vector.extract_strided_slice %17 {offsets = [0, 0], sizes = [1, 32], strides = [1, 1]} : vector<1x128xf32> to vector<1x32xf32>
    %19 = vector.extract_strided_slice %17 {offsets = [0, 32], sizes = [1, 32], strides = [1, 1]} : vector<1x128xf32> to vector<1x32xf32>
    %20 = vector.extract_strided_slice %17 {offsets = [0, 64], sizes = [1, 32], strides = [1, 1]} : vector<1x128xf32> to vector<1x32xf32>
    %21 = vector.extract_strided_slice %13 {offsets = [0, 96], sizes = [1, 32], strides = [1, 1]} : vector<1x128xf32> to vector<1x32xf32>
    %22 = arith.mulf %19, %1 : vector<1x32xf32>
    %23 = arith.mulf %18, %21 : vector<1x32xf32>
    %24 = arith.addf %22, %23 : vector<1x32xf32>
    %25 = math.tanh %24 : vector<1x32xf32>
    %26 = arith.mulf %20, %25 : vector<1x32xf32>
    %c1_16 = arith.constant 1 : index
    %c0_17 = arith.constant 0 : index
    %27 = vector.load %arg8[%c1_16, %c0_17] : memref<8x128xf32, #tpu.memory_space<vmem>>, vector<1x128xf32>
    %cst_18 = arith.constant dense<0.000000e+00> : vector<1x128xf32>
    %28 = tpu.matmul %26, %9, %cst_18 {dimension_numbers = #tpu.dot_dimension_numbers<[1], [0], [0], [1], [0, 0, 1, 1], [], []>} : vector<1x32xf32>, vector<32x128xf32>, vector<1x128xf32> -> vector<1x128xf32>
    %29 = arith.addf %28, %27 : vector<1x128xf32>
    %30 = math.tanh %29 : vector<1x128xf32>
    %cst_19 = arith.constant 5.000000e-01 : f32
    %31 = vector.broadcast %cst_19 : f32 to vector<1x128xf32>
    %32 = arith.mulf %31, %30 : vector<1x128xf32>
    %cst_20 = arith.constant 5.000000e-01 : f32
    %33 = vector.broadcast %cst_20 : f32 to vector<1x128xf32>
    %34 = arith.addf %32, %33 : vector<1x128xf32>
    %35 = vector.extract_strided_slice %34 {offsets = [0, 0], sizes = [1, 32], strides = [1, 1]} : vector<1x128xf32> to vector<1x32xf32>
    %36 = vector.extract_strided_slice %34 {offsets = [0, 32], sizes = [1, 32], strides = [1, 1]} : vector<1x128xf32> to vector<1x32xf32>
    %37 = vector.extract_strided_slice %34 {offsets = [0, 64], sizes = [1, 32], strides = [1, 1]} : vector<1x128xf32> to vector<1x32xf32>
    %38 = vector.extract_strided_slice %30 {offsets = [0, 96], sizes = [1, 32], strides = [1, 1]} : vector<1x128xf32> to vector<1x32xf32>
    %39 = arith.mulf %36, %24 : vector<1x32xf32>
    %40 = arith.mulf %35, %38 : vector<1x32xf32>
    %41 = arith.addf %39, %40 : vector<1x32xf32>
    %42 = math.tanh %41 : vector<1x32xf32>
    %43 = arith.mulf %37, %42 : vector<1x32xf32>
    %c2_21 = arith.constant 2 : index
    %c0_22 = arith.constant 0 : index
    %44 = vector.load %arg8[%c2_21, %c0_22] : memref<8x128xf32, #tpu.memory_space<vmem>>, vector<1x128xf32>
    %cst_23 = arith.constant dense<0.000000e+00> : vector<1x128xf32>
    %45 = tpu.matmul %43, %9, %cst_23 {dimension_numbers = #tpu.dot_dimension_numbers<[1], [0], [0], [1], [0, 0, 1, 1], [], []>} : vector<1x32xf32>, vector<32x128xf32>, vector<1x128xf32> -> vector<1x128xf32>
    %46 = arith.addf %45, %44 : vector<1x128xf32>
    %47 = math.tanh %46 : vector<1x128xf32>
    %cst_24 = arith.constant 5.000000e-01 : f32
    %48 = vector.broadcast %cst_24 : f32 to vector<1x128xf32>
    %49 = arith.mulf %48, %47 : vector<1x128xf32>
    %cst_25 = arith.constant 5.000000e-01 : f32
    %50 = vector.broadcast %cst_25 : f32 to vector<1x128xf32>
    %51 = arith.addf %49, %50 : vector<1x128xf32>
    %52 = vector.extract_strided_slice %51 {offsets = [0, 0], sizes = [1, 32], strides = [1, 1]} : vector<1x128xf32> to vector<1x32xf32>
    %53 = vector.extract_strided_slice %51 {offsets = [0, 32], sizes = [1, 32], strides = [1, 1]} : vector<1x128xf32> to vector<1x32xf32>
    %54 = vector.extract_strided_slice %51 {offsets = [0, 64], sizes = [1, 32], strides = [1, 1]} : vector<1x128xf32> to vector<1x32xf32>
    %55 = vector.extract_strided_slice %47 {offsets = [0, 96], sizes = [1, 32], strides = [1, 1]} : vector<1x128xf32> to vector<1x32xf32>
    %56 = arith.mulf %53, %41 : vector<1x32xf32>
    %57 = arith.mulf %52, %55 : vector<1x32xf32>
    %58 = arith.addf %56, %57 : vector<1x32xf32>
    %59 = math.tanh %58 : vector<1x32xf32>
    %60 = arith.mulf %54, %59 : vector<1x32xf32>
    %c3 = arith.constant 3 : index
    %c0_26 = arith.constant 0 : index
    %61 = vector.load %arg8[%c3, %c0_26] : memref<8x128xf32, #tpu.memory_space<vmem>>, vector<1x128xf32>
    %cst_27 = arith.constant dense<0.000000e+00> : vector<1x128xf32>
    %62 = tpu.matmul %60, %9, %cst_27 {dimension_numbers = #tpu.dot_dimension_numbers<[1], [0], [0], [1], [0, 0, 1, 1], [], []>} : vector<1x32xf32>, vector<32x128xf32>, vector<1x128xf32> -> vector<1x128xf32>
    %63 = arith.addf %62, %61 : vector<1x128xf32>
    %64 = math.tanh %63 : vector<1x128xf32>
    %cst_28 = arith.constant 5.000000e-01 : f32
    %65 = vector.broadcast %cst_28 : f32 to vector<1x128xf32>
    %66 = arith.mulf %65, %64 : vector<1x128xf32>
    %cst_29 = arith.constant 5.000000e-01 : f32
    %67 = vector.broadcast %cst_29 : f32 to vector<1x128xf32>
    %68 = arith.addf %66, %67 : vector<1x128xf32>
    %69 = vector.extract_strided_slice %68 {offsets = [0, 0], sizes = [1, 32], strides = [1, 1]} : vector<1x128xf32> to vector<1x32xf32>
    %70 = vector.extract_strided_slice %68 {offsets = [0, 32], sizes = [1, 32], strides = [1, 1]} : vector<1x128xf32> to vector<1x32xf32>
    %71 = vector.extract_strided_slice %68 {offsets = [0, 64], sizes = [1, 32], strides = [1, 1]} : vector<1x128xf32> to vector<1x32xf32>
    %72 = vector.extract_strided_slice %64 {offsets = [0, 96], sizes = [1, 32], strides = [1, 1]} : vector<1x128xf32> to vector<1x32xf32>
    %73 = arith.mulf %70, %58 : vector<1x32xf32>
    %74 = arith.mulf %69, %72 : vector<1x32xf32>
    %75 = arith.addf %73, %74 : vector<1x32xf32>
    %76 = math.tanh %75 : vector<1x32xf32>
    %77 = arith.mulf %71, %76 : vector<1x32xf32>
    %c4 = arith.constant 4 : index
    %c0_30 = arith.constant 0 : index
    %78 = vector.load %arg8[%c4, %c0_30] : memref<8x128xf32, #tpu.memory_space<vmem>>, vector<1x128xf32>
    %cst_31 = arith.constant dense<0.000000e+00> : vector<1x128xf32>
    %79 = tpu.matmul %77, %9, %cst_31 {dimension_numbers = #tpu.dot_dimension_numbers<[1], [0], [0], [1], [0, 0, 1, 1], [], []>} : vector<1x32xf32>, vector<32x128xf32>, vector<1x128xf32> -> vector<1x128xf32>
    %80 = arith.addf %79, %78 : vector<1x128xf32>
    %81 = math.tanh %80 : vector<1x128xf32>
    %cst_32 = arith.constant 5.000000e-01 : f32
    %82 = vector.broadcast %cst_32 : f32 to vector<1x128xf32>
    %83 = arith.mulf %82, %81 : vector<1x128xf32>
    %cst_33 = arith.constant 5.000000e-01 : f32
    %84 = vector.broadcast %cst_33 : f32 to vector<1x128xf32>
    %85 = arith.addf %83, %84 : vector<1x128xf32>
    %86 = vector.extract_strided_slice %85 {offsets = [0, 0], sizes = [1, 32], strides = [1, 1]} : vector<1x128xf32> to vector<1x32xf32>
    %87 = vector.extract_strided_slice %85 {offsets = [0, 32], sizes = [1, 32], strides = [1, 1]} : vector<1x128xf32> to vector<1x32xf32>
    %88 = vector.extract_strided_slice %85 {offsets = [0, 64], sizes = [1, 32], strides = [1, 1]} : vector<1x128xf32> to vector<1x32xf32>
    %89 = vector.extract_strided_slice %81 {offsets = [0, 96], sizes = [1, 32], strides = [1, 1]} : vector<1x128xf32> to vector<1x32xf32>
    %90 = arith.mulf %87, %75 : vector<1x32xf32>
    %91 = arith.mulf %86, %89 : vector<1x32xf32>
    %92 = arith.addf %90, %91 : vector<1x32xf32>
    %93 = math.tanh %92 : vector<1x32xf32>
    %94 = arith.mulf %88, %93 : vector<1x32xf32>
    %c5 = arith.constant 5 : index
    %c0_34 = arith.constant 0 : index
    %95 = vector.load %arg8[%c5, %c0_34] : memref<8x128xf32, #tpu.memory_space<vmem>>, vector<1x128xf32>
    %cst_35 = arith.constant dense<0.000000e+00> : vector<1x128xf32>
    %96 = tpu.matmul %94, %9, %cst_35 {dimension_numbers = #tpu.dot_dimension_numbers<[1], [0], [0], [1], [0, 0, 1, 1], [], []>} : vector<1x32xf32>, vector<32x128xf32>, vector<1x128xf32> -> vector<1x128xf32>
    %97 = arith.addf %96, %95 : vector<1x128xf32>
    %98 = math.tanh %97 : vector<1x128xf32>
    %cst_36 = arith.constant 5.000000e-01 : f32
    %99 = vector.broadcast %cst_36 : f32 to vector<1x128xf32>
    %100 = arith.mulf %99, %98 : vector<1x128xf32>
    %cst_37 = arith.constant 5.000000e-01 : f32
    %101 = vector.broadcast %cst_37 : f32 to vector<1x128xf32>
    %102 = arith.addf %100, %101 : vector<1x128xf32>
    %103 = vector.extract_strided_slice %102 {offsets = [0, 0], sizes = [1, 32], strides = [1, 1]} : vector<1x128xf32> to vector<1x32xf32>
    %104 = vector.extract_strided_slice %102 {offsets = [0, 32], sizes = [1, 32], strides = [1, 1]} : vector<1x128xf32> to vector<1x32xf32>
    %105 = vector.extract_strided_slice %102 {offsets = [0, 64], sizes = [1, 32], strides = [1, 1]} : vector<1x128xf32> to vector<1x32xf32>
    %106 = vector.extract_strided_slice %98 {offsets = [0, 96], sizes = [1, 32], strides = [1, 1]} : vector<1x128xf32> to vector<1x32xf32>
    %107 = arith.mulf %104, %92 : vector<1x32xf32>
    %108 = arith.mulf %103, %106 : vector<1x32xf32>
    %109 = arith.addf %107, %108 : vector<1x32xf32>
    %110 = math.tanh %109 : vector<1x32xf32>
    %111 = arith.mulf %105, %110 : vector<1x32xf32>
    %c6 = arith.constant 6 : index
    %c0_38 = arith.constant 0 : index
    %112 = vector.load %arg8[%c6, %c0_38] : memref<8x128xf32, #tpu.memory_space<vmem>>, vector<1x128xf32>
    %cst_39 = arith.constant dense<0.000000e+00> : vector<1x128xf32>
    %113 = tpu.matmul %111, %9, %cst_39 {dimension_numbers = #tpu.dot_dimension_numbers<[1], [0], [0], [1], [0, 0, 1, 1], [], []>} : vector<1x32xf32>, vector<32x128xf32>, vector<1x128xf32> -> vector<1x128xf32>
    %114 = arith.addf %113, %112 : vector<1x128xf32>
    %115 = math.tanh %114 : vector<1x128xf32>
    %cst_40 = arith.constant 5.000000e-01 : f32
    %116 = vector.broadcast %cst_40 : f32 to vector<1x128xf32>
    %117 = arith.mulf %116, %115 : vector<1x128xf32>
    %cst_41 = arith.constant 5.000000e-01 : f32
    %118 = vector.broadcast %cst_41 : f32 to vector<1x128xf32>
    %119 = arith.addf %117, %118 : vector<1x128xf32>
    %120 = vector.extract_strided_slice %119 {offsets = [0, 0], sizes = [1, 32], strides = [1, 1]} : vector<1x128xf32> to vector<1x32xf32>
    %121 = vector.extract_strided_slice %119 {offsets = [0, 32], sizes = [1, 32], strides = [1, 1]} : vector<1x128xf32> to vector<1x32xf32>
    %122 = vector.extract_strided_slice %119 {offsets = [0, 64], sizes = [1, 32], strides = [1, 1]} : vector<1x128xf32> to vector<1x32xf32>
    %123 = vector.extract_strided_slice %115 {offsets = [0, 96], sizes = [1, 32], strides = [1, 1]} : vector<1x128xf32> to vector<1x32xf32>
    %124 = arith.mulf %121, %109 : vector<1x32xf32>
    %125 = arith.mulf %120, %123 : vector<1x32xf32>
    %126 = arith.addf %124, %125 : vector<1x32xf32>
    %127 = math.tanh %126 : vector<1x32xf32>
    %128 = arith.mulf %122, %127 : vector<1x32xf32>
    %c7 = arith.constant 7 : index
    %c0_42 = arith.constant 0 : index
    %129 = vector.load %arg8[%c7, %c0_42] : memref<8x128xf32, #tpu.memory_space<vmem>>, vector<1x128xf32>
    %cst_43 = arith.constant dense<0.000000e+00> : vector<1x128xf32>
    %130 = tpu.matmul %128, %9, %cst_43 {dimension_numbers = #tpu.dot_dimension_numbers<[1], [0], [0], [1], [0, 0, 1, 1], [], []>} : vector<1x32xf32>, vector<32x128xf32>, vector<1x128xf32> -> vector<1x128xf32>
    %131 = arith.addf %130, %129 : vector<1x128xf32>
    %132 = math.tanh %131 : vector<1x128xf32>
    %cst_44 = arith.constant 5.000000e-01 : f32
    %133 = vector.broadcast %cst_44 : f32 to vector<1x128xf32>
    %134 = arith.mulf %133, %132 : vector<1x128xf32>
    %cst_45 = arith.constant 5.000000e-01 : f32
    %135 = vector.broadcast %cst_45 : f32 to vector<1x128xf32>
    %136 = arith.addf %134, %135 : vector<1x128xf32>
    %137 = vector.extract_strided_slice %136 {offsets = [0, 0], sizes = [1, 32], strides = [1, 1]} : vector<1x128xf32> to vector<1x32xf32>
    %138 = vector.extract_strided_slice %136 {offsets = [0, 32], sizes = [1, 32], strides = [1, 1]} : vector<1x128xf32> to vector<1x32xf32>
    %139 = vector.extract_strided_slice %136 {offsets = [0, 64], sizes = [1, 32], strides = [1, 1]} : vector<1x128xf32> to vector<1x32xf32>
    %140 = vector.extract_strided_slice %132 {offsets = [0, 96], sizes = [1, 32], strides = [1, 1]} : vector<1x128xf32> to vector<1x32xf32>
    %141 = arith.mulf %138, %126 : vector<1x32xf32>
    %142 = arith.mulf %137, %140 : vector<1x32xf32>
    %143 = arith.addf %141, %142 : vector<1x32xf32>
    %144 = math.tanh %143 : vector<1x32xf32>
    %145 = arith.mulf %139, %144 : vector<1x32xf32>
    %c3_46 = arith.constant 3 : index
    %c0_47 = arith.constant 0 : index
    %146 = vector.load %arg4[%c3_46, %c0_47] : memref<4x128xf32, #tpu.memory_space<vmem>>, vector<1x128xf32>
    %c0_48 = arith.constant 0 : index
    %c0_49 = arith.constant 0 : index
    %147 = vector.load %arg3[%c0_48, %c0_49] : memref<32x128xf32, #tpu.memory_space<vmem>>, vector<32x128xf32>
    %cst_50 = arith.constant dense<0.000000e+00> : vector<1x128xf32>
    %148 = tpu.matmul %145, %147, %cst_50 {dimension_numbers = #tpu.dot_dimension_numbers<[1], [0], [0], [1], [0, 0, 1, 1], [], []>} : vector<1x32xf32>, vector<32x128xf32>, vector<1x128xf32> -> vector<1x128xf32>
    %149 = arith.addf %148, %146 : vector<1x128xf32>
    %cst_51 = arith.constant dense<0xFF800000> : vector<1xf32>
    %150 = vector.multi_reduction <maximumf>, %149, %cst_51 [1] : vector<1x128xf32> to vector<1xf32>
    %151 = vector.shape_cast %150 : vector<1xf32> to vector<1x1xf32>
    %152 = vector.broadcast %151 : vector<1x1xf32> to vector<1x128xf32>
    %153 = arith.subf %149, %152 : vector<1x128xf32>
    %154 = math.exp %153 : vector<1x128xf32>
    %cst_52 = arith.constant dense<0.000000e+00> : vector<1xf32>
    %155 = vector.multi_reduction <add>, %154, %cst_52 [1] : vector<1x128xf32> to vector<1xf32>
    %156 = vector.shape_cast %155 : vector<1xf32> to vector<1x1xf32>
    %157 = math.log %156 : vector<1x1xf32>
    %158 = vector.broadcast %157 : vector<1x1xf32> to vector<1x128xf32>
    %159 = arith.subf %153, %158 : vector<1x128xf32>
    %c0_53 = arith.constant 0 : index
    %c0_54 = arith.constant 0 : index
    %160 = vector.load %arg5[%c0_53, %c0_54] : memref<1x128xf32, #tpu.memory_space<vmem>>, vector<1x128xf32>
    tpu.vector_store %arg5[%c0_53, %c0_54], %159 {strides = array<i32>} : memref<1x128xf32, #tpu.memory_space<vmem>>, vector<1x128xf32>,
    %c0_55 = arith.constant 0 : index
    %c0_56 = arith.constant 0 : index
    %161 = vector.load %arg6[%c0_55, %c0_56] : memref<1x32xf32, #tpu.memory_space<vmem>>, vector<1x32xf32>
    tpu.vector_store %arg6[%c0_55, %c0_56], %145 {strides = array<i32>} : memref<1x32xf32, #tpu.memory_space<vmem>>, vector<1x32xf32>,
    %c0_57 = arith.constant 0 : index
    %c0_58 = arith.constant 0 : index
    %162 = vector.load %arg7[%c0_57, %c0_58] : memref<1x32xf32, #tpu.memory_space<vmem>>, vector<1x32xf32>
    tpu.vector_store %arg7[%c0_57, %c0_58], %143 {strides = array<i32>} : memref<1x32xf32, #tpu.memory_space<vmem>>, vector<1x32xf32>,
    return
  }
}

</mosaic_0001>

<bundles_post_ra>
// kernel: lstm_forward.1
= control target key start
LH: loop header
LB: loop body
LE: loop exit
PB: predicated region body
PF: predicated region fallthrough
CT: control target
= control target key end

     0   :  { %13 = vsyncpa [#allocation4], 0  ;;  %s1651_s0 = inlined_call_operand.vmem [shape: f32[8,32], index: 0, kind: input, shape index: {}]   ;;  %s1652_s1 = inlined_call_operand.hbm [shape: f32[32,128], index: 1, kind: input, shape index: {}]   ;;  %s1653_s2 = inlined_call_operand.hbm [shape: f32[32,128], index: 2, kind: input, shape index: {}]   ;;  %s1654_s3 = inlined_call_operand.hbm [shape: f32[32,128], index: 3, kind: input, shape index: {}]   ;;  %s1655_s4 = inlined_call_operand.vmem [shape: f32[4,128], index: 4, kind: input, shape index: {}]   ;;  %s1656_s5 = inlined_call_operand.hbm [shape: f32[1,128], index: 5, kind: output, shape index: {0}]   ;;  %s1657_s6 = inlined_call_operand.hbm [shape: f32[1,32], index: 6, kind: output, shape index: {1}]   ;;  %s1658_s7 = inlined_call_operand.hbm [shape: f32[1,32], index: 7, kind: output, shape index: {2}]  }
   0x1   :  { %14 = vsyncpa [#allocation7], 0 }
   0x2   :  { %15 = vsyncpa [#allocation5], 0 }
   0x3   :  { %16 = vsyncpa [#allocation11], 0  ;;  %s1420_s24 = smov [#allocation6]   ;;  %s1421_s26 = smov [#allocation3]  }
   0x4   :  { %s36_s25 = sshll.u32 %s1420_s24, 4  ;;  %s24_s27 = sshll.u32 %s1421_s26, 4  ;;  %s37_s25 = int_to_ptr.vmem [resolvable:$true] %s36_s25  ;;  %s25_s27 = int_to_ptr.vmem [resolvable:$true] %s24_s27 }
   0x5   :  { %s1300_s28 = scalar_lea.vmem %s37_s25, 512  ;;  %p1305_p1 = scmp.lt.s32.totalorder %s37_s25, %s37_s25 }
   0x6   :  { %p1301_p0 = scmp.ne.s32.totalorder %s37_s25, %s1300_s28  ;;  %p1306_p2 = scmp.lt.s32.totalorder %s1300_s28, %s1300_s28 }
   0x8   :  { %p1307_p3 = por %p1306_p2, %p1305_p1 }
   0xa   :  { %p1308_p4 = pnand %p1307_p3, %p1301_p0 }
   0xc   :  { %1311 = shalt.err (!%p1308_p4)
}
   0xd   :  { %s1422_s29 = smov 128   ;;  %s1423_s30 = smov 8  }
   0xe   :  { %42 = dma.hbm_to_vmem [thread:$0]  %s1653_s2, 512, %s37_s25, [#allocation7], %s1422_s29, %s1422_s29, %s1423_s30  }
   0xf   :  { %s1320_s10 = scalar_lea.vmem %s25_s27, 512  ;;  %p1325_p6 = scmp.lt.s32.totalorder %s25_s27, %s25_s27 }
  0x10   :  { %p1321_p5 = scmp.ne.s32.totalorder %s25_s27, %s1320_s10  ;;  %p1326_p7 = scmp.lt.s32.totalorder %s1320_s10, %s1320_s10 }
  0x12   :  { %p1327_p8 = por %p1326_p7, %p1325_p6 }
  0x14   :  { %p1328_p9 = pnand %p1327_p8, %p1321_p5 }
  0x16   :  { %1331 = shalt.err (!%p1328_p9)
}
  0x17   :  { %30 = dma.hbm_to_vmem [thread:$0]  %s1652_s1, 512, %s25_s27, [#allocation4], %s1422_s29, %s1422_s29, %s1423_s30  }
  0x18   :  { %s1424_s13 = smov [#allocation8]  }
  0x19   :  { %s48_s14 = sshll.u32 %s1424_s13, 4  ;;  %s49_s14 = int_to_ptr.vmem [resolvable:$true] %s48_s14 }
  0x1a   :  { %s1340_s15 = scalar_lea.vmem %s49_s14, 512  ;;  %p1345_p11 = scmp.lt.s32.totalorder %s49_s14, %s49_s14 }
  0x1b   :  { %p1341_p10 = scmp.ne.s32.totalorder %s49_s14, %s1340_s15  ;;  %p1346_p12 = scmp.lt.s32.totalorder %s1340_s15, %s1340_s15 }
  0x1d   :  { %p1347_p13 = por %p1346_p12, %p1345_p11 }
  0x1f   :  { %p1348_p0 = pnand %p1347_p13, %p1341_p10 }
  0x21   :  { %1351 = shalt.err (!%p1348_p0)
}
  0x22   :  { %54 = dma.hbm_to_vmem [thread:$0]  %s1654_s3, 512, %s49_s14, [#allocation7], %s1422_s29, %s1422_s29, %s1423_s30  }
  0x23   :  { %1412 = dma.done.wait [#allocation4], 512  }
  0x24   :  { %1413 = vsyncadd [#allocation4], 4294966784 }
  0x25   :  { %1414 = dma.done.wait [#allocation7], 1024  }
  0x26   :  { %1415 = vsyncadd [#allocation7], 4294966272  ;;  %v1425_v0 = vmov 0.0   ;;  %vm1426_vm0 = vmmov 0   ;;  %v73_v1 = vld [vmem:[#allocation3 + $0x18] sm:$0xff]  ;;  %v72_v2 = vld [vmem:[#allocation3 + $0x10] sm:$0xff] }
  0x27   :  { %1133 = vmatprep.subr.mxu0 %v1425_v0  ;;  %1141 = vmatprep.mubr.msk.f32.mxu0 %vm1426_vm0, %v1425_v0  ;;  %v1488_v3 = vld [vmem:[#allocation6 + $0x18] sm:$0xff]  ;;  %v71_v4 = vld [vmem:[#allocation3 + $0x8] sm:$0xff]  ;;  %v1492_v5 = vld [vmem:[#allocation6 + $0x10] sm:$0xff]  ;;  %vm78_vm1 = vcmask 261120   ;;  %s1427_s20 = smov 32   ;;  %s1428_s23 = smov 64  }
  0x28   :  { %1144 = vmatprep.subr.mxu1 %v1425_v0  ;;  %1152 = vmatprep.mubr.msk.f32.mxu1 %vm1426_vm0, %v1425_v0  ;;  %v1495_v6 = vld [vmem:[#allocation6 + $0x8] sm:$0xff]  ;;  %v70_v7 = vld [vmem:[#allocation3] sm:$0xff]  ;;  %v69_v8 = vld [vmem:[%s1651_s0] sm:$0xff]  ;;  %vm1022_vm2 = vcmask 253952   ;;  %vm1007_vm3 = vcmask 1040384   ;;  %s1429_s26 = smov 96  }
  0x29   :  { %1134 = vmatpush3.msra.mxu0 %v73_v1  ;;  %1145 = vmatpush3.msra.mxu1 %v1488_v3  ;;  %v1503_v9 = vld [vmem:[#allocation6] sm:$0xff]  ;;  %v66_v10 = vld [vmem:[%s1655_s4] sm:$0x1]  ;;  %v1072_v11 = vld [vmem:[%s1655_s4 + $0x2] ss:$0 sm:$0xff]  ;;  %s1430_s27 = smov [#allocation10]  }
  0x2a   :  { %1135 = vmatprep.subr.mxu0 %v1425_v0  ;;  %1146 = vmatprep.subr.mxu1 %v1425_v0  ;;  %v67_v20 = vld [vmem:[%s1655_s4 + $0x1] sm:$0x1]  ;;  %s1045_s28 = sshll.u32 %s1430_s27, 4  ;;  %s1046_s28 = int_to_ptr.vmem [resolvable:$true] %s1045_s28 }
  0x2b   :  { %1136 = vmatpush3.msra.mxu0 %v72_v2  ;;  %1147 = vmatpush3.msra.mxu1 %v1492_v5  ;;  %s1352_s29 = scalar_lea.vmem %s1046_s28, 16  ;;  %p1357_p2 = scmp.lt.s32.totalorder %s1046_s28, %s1046_s28 }
  0x2c   :  { %1137 = vmatprep.subr.mxu0 %v1425_v0  ;;  %1148 = vmatprep.subr.mxu1 %v1425_v0  ;;  %p1353_p1 = scmp.ne.s32.totalorder %s1046_s28, %s1352_s29 }
  0x2d   :  { %1138 = vmatpush3.msra.mxu0 %v71_v4  ;;  %1149 = vmatpush3.msra.mxu1 %v1495_v6 }
  0x2e   :  { %1139 = vmatprep.subr.mxu0 %v1425_v0  ;;  %1150 = vmatprep.subr.mxu1 %v1425_v0 }
  0x2f   :  { %1140 = vmatpush3.msra.mxu0 %v70_v7  ;;  %1151 = vmatpush3.msra.mxu1 %v1503_v9 }
  0x30   :  { %1142 = vmatmul.mubr.msk.f32.vlgmr.msra.gmra.mxu0 %vm78_vm1, %v69_v8  ;;  %1153 = vmatmul.mubr.msk.f32.vlgmr.msra.gmra.mxu1 %vm78_vm1, %v66_v10 }
  0x31   :  { %1155 = vmatprep.subr.mxu0 %v1425_v0  ;;  %1163 = vmatprep.mubr.msk.f32.mxu0 %vm1426_vm0, %v1425_v0 }
  0x32   :  { %1156 = vmatpush3.msra.mxu0 %v1488_v3  ;;  %1166 = vmatprep.subr.mxu1 %v1425_v0 }
  0x33   :  { %1157 = vmatprep.subr.mxu0 %v1425_v0  ;;  %1167 = vmatpush3.msra.mxu1 %v1488_v3 }
  0x34   :  { %1158 = vmatpush3.msra.mxu0 %v1492_v5  ;;  %1168 = vmatprep.subr.mxu1 %v1425_v0 }
  0x35   :  { %1159 = vmatprep.subr.mxu0 %v1425_v0  ;;  %1169 = vmatpush3.msra.mxu1 %v1492_v5 }
  0x36   :  { %1160 = vmatpush3.msra.mxu0 %v1495_v6  ;;  %1170 = vmatprep.subr.mxu1 %v1425_v0 }
  0x37   :  { %1161 = vmatprep.subr.mxu0 %v1425_v0  ;;  %1171 = vmatpush3.msra.mxu1 %v1495_v6 }
  0x38   :  { %1162 = vmatpush3.msra.mxu0 %v1503_v9  ;;  %1172 = vmatprep.subr.mxu1 %v1425_v0 }
  0x39   :  { %1174 = vmatprep.mubr.msk.f32.mxu1 %vm1426_vm0, %v1425_v0  ;;  %1173 = vmatpush3.msra.mxu1 %v1503_v9 }
  0x3a   :  { %1177 = vmatprep.subr.mxu0 %v1425_v0  ;;  %1188 = vmatprep.subr.mxu1 %v1425_v0 }
  0xf0   :  { %v148_v12 = vpop.f32.mrf.mxu0  ;;  %v227_v14 = vpop.f32.mrf.mxu1 }
  0xf1   :  { %v149_v13 = vadd.f32 %v1072_v11, %v148_v12 }
  0xf2   :  { %v1143_v15 = vpop.f32.mrf.mxu0  ;;  %v1154_v16 = vpop.f32.mrf.mxu1 }
  0xf3   :  { %152 = vst [vmem:[#allocation2] sm:$0xff] %v149_v13 }
  0xfa   :  { %v157_v17 = vld [vmem:[#allocation2] sm:$0x1]  ;;  %v255_v33 = vld [vmem:[#allocation2 + $0x1] sm:$0x1]  ;;  %v351_v49 = vld [vmem:[#allocation2 + $0x2] sm:$0x1] }
  0xfb   :  { %v228_v18 = vadd.f32 %v227_v14, %v157_v17  ;;  %v447_v2 = vld [vmem:[#allocation2 + $0x3] sm:$0x1] }
  0xfd   :  { %1256 = vtanh.f32 %v228_v18 }
 0x10a   :  { %v1257_v19 = vpop.eup %1256 }
 0x10b   :  { %240 = vrot.lane.b32.xlu0 %v1257_v19, %s1427_s20  ;;  %v232_v21 = vmul.f32 0.5, %v1257_v19 }
 0x10d   :  { %v233_v22 = vadd.f32 0.5, %v232_v21 }
 0x10f   :  { %235 = vrot.lane.b32.xlu0 %v67_v20, %s1427_s20 }
 0x17d   :  { %v241_v23 = vpop.permute.xlu0 %240 }
 0x17e   :  { %v243_v24 = vmul.f32 %v241_v23, %v233_v22 }
 0x180   :  { %245 = vrot.lane.b32.xlu1 %v243_v24, %s1427_s20 }
 0x181   :  { %v236_v25 = vpop.permute.xlu0 %235 }
 0x182   :  { %v238_v26 = vmul.f32 %v236_v25, %v233_v22 }
 0x1f2   :  { %v246_v27 = vpop.permute.xlu1 %245 }
 0x1f3   :  { %v248_v28 = vadd.f32 %v246_v27, %v238_v26 }
 0x1f5   :  { %1258 = vtanh.f32 %v248_v28 }
 0x202   :  { %v1259_v29 = vpop.eup %1258 }
 0x203   :  { %251 = vrot.lane.b32.xlu1 %v1259_v29, %s1427_s20 }
 0x275   :  { %v252_v30 = vpop.permute.xlu1 %251 }
 0x276   :  { %v254_v31 = vmul.f32 %v252_v30, %v233_v22  ;;  %v543_v22 = vld [vmem:[#allocation2 + $0x4] sm:$0x1] }
 0x278   :  { %257 = vrot.lane.b32.xlu0 %v254_v31, %s1428_s23 }
 0x2ea   :  { %v258_v32 = vpop.permute.xlu0 %257 }
 0x2eb   :  { %1164 = vmatmul.mubr.msk.f32.vlgmr.msra.gmra.mxu0 %vm78_vm1, %v258_v32 }
 0x2ec   :  { %1178 = vmatpush3.msra.mxu0 %v1488_v3  ;;  %1185 = vmatprep.mubr.msk.f32.mxu0 %vm1426_vm0, %v1425_v0 }
 0x2ed   :  { %1179 = vmatprep.subr.mxu0 %v1425_v0 }
 0x2ee   :  { %1180 = vmatpush3.msra.mxu0 %v1492_v5 }
 0x2ef   :  { %1181 = vmatprep.subr.mxu0 %v1425_v0 }
 0x2f0   :  { %1182 = vmatpush3.msra.mxu0 %v1495_v6 }
 0x2f1   :  { %1183 = vmatprep.subr.mxu0 %v1425_v0 }
 0x2f2   :  { %1184 = vmatpush3.msra.mxu0 %v1503_v9 }
 0x2f3   :  { %1199 = vmatprep.subr.mxu0 %v1425_v0 }
 0x3ab   :  { %v327_v34 = vpop.f32.mrf.mxu0 }
 0x3ac   :  { %v328_v35 = vadd.f32 %v327_v34, %v255_v33 }
 0x3ad   :  { %v1165_v36 = vpop.f32.mrf.mxu0 }
 0x3ae   :  { %1260 = vtanh.f32 %v328_v35 }
 0x3bb   :  { %v1261_v37 = vpop.eup %1260 }
 0x3bc   :  { %336 = vrot.lane.b32.xlu1 %v1261_v37, %s1427_s20  ;;  %v332_v38 = vmul.f32 0.5, %v1261_v37 }
 0x3be   :  { %v333_v39 = vadd.f32 0.5, %v332_v38  ;;  %v639_v38 = vld [vmem:[#allocation2 + $0x5] sm:$0x1] }
 0x3c0   :  { %v334_v42 = vmul.f32 %v333_v39, %v248_v28 }
 0x42e   :  { %v337_v40 = vpop.permute.xlu1 %336 }
 0x42f   :  { %v339_v41 = vmul.f32 %v337_v40, %v333_v39 }
 0x431   :  { %341 = vrot.lane.b32.xlu0 %v339_v41, %s1427_s20 }
 0x4a3   :  { %v342_v43 = vpop.permute.xlu0 %341 }
 0x4a4   :  { %v344_v44 = vadd.f32 %v342_v43, %v334_v42 }
 0x4a6   :  { %1262 = vtanh.f32 %v344_v44 }
 0x4b3   :  { %v1263_v45 = vpop.eup %1262 }
 0x4b4   :  { %347 = vrot.lane.b32.xlu1 %v1263_v45, %s1427_s20 }
 0x526   :  { %v348_v46 = vpop.permute.xlu1 %347 }
 0x527   :  { %v350_v47 = vmul.f32 %v348_v46, %v333_v39 }
 0x529   :  { %353 = vrot.lane.b32.xlu0 %v350_v47, %s1428_s23 }
 0x59b   :  { %v354_v48 = vpop.permute.xlu0 %353 }
 0x59c   :  { %1175 = vmatmul.mubr.msk.f32.vlgmr.msra.gmra.mxu1 %vm78_vm1, %v354_v48 }
 0x59d   :  { %1189 = vmatpush3.msra.mxu1 %v1488_v3  ;;  %1196 = vmatprep.mubr.msk.f32.mxu1 %vm1426_vm0, %v1425_v0 }
 0x59e   :  { %1190 = vmatprep.subr.mxu1 %v1425_v0 }
 0x59f   :  { %1191 = vmatpush3.msra.mxu1 %v1492_v5 }
 0x5a0   :  { %1192 = vmatprep.subr.mxu1 %v1425_v0 }
 0x5a1   :  { %1193 = vmatpush3.msra.mxu1 %v1495_v6 }
 0x5a2   :  { %1194 = vmatprep.subr.mxu1 %v1425_v0 }
 0x5a3   :  { %1195 = vmatpush3.msra.mxu1 %v1503_v9 }
 0x5a4   :  { %1210 = vmatprep.subr.mxu1 %v1425_v0 }
 0x65c   :  { %v423_v50 = vpop.f32.mrf.mxu1 }
 0x65d   :  { %v424_v51 = vadd.f32 %v423_v50, %v351_v49  ;;  %v735_v50 = vld [vmem:[#allocation2 + $0x6] sm:$0x1] }
 0x65e   :  { %v1176_v52 = vpop.f32.mrf.mxu1 }
 0x65f   :  { %1264 = vtanh.f32 %v424_v51 }
 0x66c   :  { %v1265_v53 = vpop.eup %1264 }
 0x66d   :  { %432 = vrot.lane.b32.xlu1 %v1265_v53, %s1427_s20  ;;  %v428_v54 = vmul.f32 0.5, %v1265_v53 }
 0x66f   :  { %v429_v55 = vadd.f32 0.5, %v428_v54 }
 0x671   :  { %v430_v58 = vmul.f32 %v429_v55, %v344_v44 }
 0x6df   :  { %v433_v56 = vpop.permute.xlu1 %432 }
 0x6e0   :  { %v435_v57 = vmul.f32 %v433_v56, %v429_v55 }
 0x6e2   :  { %437 = vrot.lane.b32.xlu0 %v435_v57, %s1427_s20 }
 0x754   :  { %v438_v59 = vpop.permute.xlu0 %437 }
 0x755   :  { %v440_v60 = vadd.f32 %v438_v59, %v430_v58 }
 0x757   :  { %1266 = vtanh.f32 %v440_v60 }
 0x764   :  { %v1267_v61 = vpop.eup %1266 }
 0x765   :  { %443 = vrot.lane.b32.xlu1 %v1267_v61, %s1427_s20 }
 0x7d7   :  { %v444_v62 = vpop.permute.xlu1 %443 }
 0x7d8   :  { %v446_v63 = vmul.f32 %v444_v62, %v429_v55 }
 0x7da   :  { %449 = vrot.lane.b32.xlu0 %v446_v63, %s1428_s23 }
 0x84c   :  { %v450_v1 = vpop.permute.xlu0 %449 }
 0x84d   :  { %1186 = vmatmul.mubr.msk.f32.vlgmr.msra.gmra.mxu0 %vm78_vm1, %v450_v1 }
 0x84e   :  { %1200 = vmatpush3.msra.mxu0 %v1488_v3  ;;  %1207 = vmatprep.mubr.msk.f32.mxu0 %vm1426_vm0, %v1425_v0 }
 0x84f   :  { %1201 = vmatprep.subr.mxu0 %v1425_v0 }
 0x850   :  { %1202 = vmatpush3.msra.mxu0 %v1492_v5 }
 0x851   :  { %1203 = vmatprep.subr.mxu0 %v1425_v0 }
 0x852   :  { %1204 = vmatpush3.msra.mxu0 %v1495_v6 }
 0x853   :  { %1205 = vmatprep.subr.mxu0 %v1425_v0 }
 0x854   :  { %1206 = vmatpush3.msra.mxu0 %v1503_v9 }
 0x855   :  { %1221 = vmatprep.subr.mxu0 %v1425_v0 }
 0x90d   :  { %v519_v4 = vpop.f32.mrf.mxu0 }
 0x90e   :  { %v520_v7 = vadd.f32 %v519_v4, %v447_v2  ;;  %v831_v4 = vld [vmem:[#allocation2 + $0x7] sm:$0x1] }
 0x90f   :  { %v1187_v8 = vpop.f32.mrf.mxu0 }
 0x910   :  { %1268 = vtanh.f32 %v520_v7 }
 0x91d   :  { %v1269_v10 = vpop.eup %1268 }
 0x91e   :  { %528 = vrot.lane.b32.xlu1 %v1269_v10, %s1427_s20  ;;  %v524_v11 = vmul.f32 0.5, %v1269_v10 }
 0x920   :  { %v525_v12 = vadd.f32 0.5, %v524_v11 }
 0x922   :  { %v526_v15 = vmul.f32 %v525_v12, %v440_v60 }
 0x990   :  { %v529_v13 = vpop.permute.xlu1 %528 }
 0x991   :  { %v531_v14 = vmul.f32 %v529_v13, %v525_v12 }
 0x993   :  { %533 = vrot.lane.b32.xlu0 %v531_v14, %s1427_s20 }
 0xa05   :  { %v534_v16 = vpop.permute.xlu0 %533 }
 0xa06   :  { %v536_v17 = vadd.f32 %v534_v16, %v526_v15 }
 0xa08   :  { %1270 = vtanh.f32 %v536_v17 }
 0xa15   :  { %v1271_v18 = vpop.eup %1270 }
 0xa16   :  { %539 = vrot.lane.b32.xlu1 %v1271_v18, %s1427_s20 }
 0xa88   :  { %v540_v19 = vpop.permute.xlu1 %539 }
 0xa89   :  { %v542_v20 = vmul.f32 %v540_v19, %v525_v12  ;;  %v931_v19 = vld [vmem:[#allocation8 + $0x18] sm:$0xff] }
 0xa8b   :  { %545 = vrot.lane.b32.xlu0 %v542_v20, %s1428_s23  ;;  %v930_v20 = vld [vmem:[#allocation8 + $0x10] sm:$0xff] }
 0xafd   :  { %v546_v21 = vpop.permute.xlu0 %545 }
 0xafe   :  { %1197 = vmatmul.mubr.msk.f32.vlgmr.msra.gmra.mxu1 %vm78_vm1, %v546_v21  ;;  %v929_v21 = vld [vmem:[#allocation8 + $0x8] sm:$0xff] }
 0xaff   :  { %1211 = vmatpush3.msra.mxu1 %v1488_v3  ;;  %1218 = vmatprep.mubr.msk.f32.mxu1 %vm1426_vm0, %v1425_v0 }
 0xb00   :  { %1212 = vmatprep.subr.mxu1 %v1425_v0 }
 0xb01   :  { %1213 = vmatpush3.msra.mxu1 %v1492_v5 }
 0xb02   :  { %1214 = vmatprep.subr.mxu1 %v1425_v0 }
 0xb03   :  { %1215 = vmatpush3.msra.mxu1 %v1495_v6 }
 0xb04   :  { %1216 = vmatprep.subr.mxu1 %v1425_v0 }
 0xb05   :  { %1217 = vmatpush3.msra.mxu1 %v1503_v9 }
 0xb06   :  { %1232 = vmatprep.subr.mxu1 %v1425_v0 }
 0xbbe   :  { %v615_v23 = vpop.f32.mrf.mxu1 }
 0xbbf   :  { %v616_v24 = vadd.f32 %v615_v23, %v543_v22  ;;  %v928_v22 = vld [vmem:[#allocation8] sm:$0xff] }
 0xbc0   :  { %v1198_v25 = vpop.f32.mrf.mxu1 }
 0xbc1   :  { %1272 = vtanh.f32 %v616_v24 }
 0xbce   :  { %v1273_v26 = vpop.eup %1272 }
 0xbcf   :  { %624 = vrot.lane.b32.xlu1 %v1273_v26, %s1427_s20  ;;  %v620_v27 = vmul.f32 0.5, %v1273_v26 }
 0xbd1   :  { %v621_v28 = vadd.f32 0.5, %v620_v27  ;;  %v927_v27 = vld [vmem:[%s1655_s4 + $0x3] sm:$0x1]  ;;  %s1356_s4 = scalar_lea.vmem %s1046_s28, 32 }
 0xbd2   :  { %p1358_p3 = scmp.lt.s32.totalorder %s1356_s4, %s1352_s29 }
 0xbd3   :  { %v622_v31 = vmul.f32 %v621_v28, %v536_v17 }
 0xbd4   :  { %p1359_p4 = por %p1358_p3, %p1357_p2 }
 0xbd6   :  { %p1360_p5 = pnand %p1359_p4, %p1353_p1 }
 0xc41   :  { %v625_v29 = vpop.permute.xlu1 %624 }
 0xc42   :  { %v627_v30 = vmul.f32 %v625_v29, %v621_v28 }
 0xc44   :  { %629 = vrot.lane.b32.xlu0 %v627_v30, %s1427_s20 }
 0xcb6   :  { %v630_v32 = vpop.permute.xlu0 %629 }
 0xcb7   :  { %v632_v33 = vadd.f32 %v630_v32, %v622_v31 }
 0xcb9   :  { %1274 = vtanh.f32 %v632_v33 }
 0xcc6   :  { %v1275_v34 = vpop.eup %1274 }
 0xcc7   :  { %635 = vrot.lane.b32.xlu1 %v1275_v34, %s1427_s20 }
 0xd39   :  { %v636_v35 = vpop.permute.xlu1 %635 }
 0xd3a   :  { %v638_v36 = vmul.f32 %v636_v35, %v621_v28 }
 0xd3c   :  { %641 = vrot.lane.b32.xlu0 %v638_v36, %s1428_s23 }
 0xdae   :  { %v642_v37 = vpop.permute.xlu0 %641 }
 0xdaf   :  { %1208 = vmatmul.mubr.msk.f32.vlgmr.msra.gmra.mxu0 %vm78_vm1, %v642_v37 }
 0xdb0   :  { %1222 = vmatpush3.msra.mxu0 %v1488_v3  ;;  %1229 = vmatprep.mubr.msk.f32.mxu0 %vm1426_vm0, %v1425_v0 }
 0xdb1   :  { %1223 = vmatprep.subr.mxu0 %v1425_v0 }
 0xdb2   :  { %1224 = vmatpush3.msra.mxu0 %v1492_v5 }
 0xdb3   :  { %1225 = vmatprep.subr.mxu0 %v1425_v0 }
 0xdb4   :  { %1226 = vmatpush3.msra.mxu0 %v1495_v6 }
 0xdb5   :  { %1227 = vmatprep.subr.mxu0 %v1425_v0 }
 0xdb6   :  { %1228 = vmatpush3.msra.mxu0 %v1503_v9 }
 0xe6f   :  { %v711_v39 = vpop.f32.mrf.mxu0 }
 0xe70   :  { %v712_v40 = vadd.f32 %v711_v39, %v639_v38 }
 0xe71   :  { %v1209_v41 = vpop.f32.mrf.mxu0 }
 0xe72   :  { %1276 = vtanh.f32 %v712_v40 }
 0xe7f   :  { %v1277_v3 = vpop.eup %1276 }
 0xe80   :  { %720 = vrot.lane.b32.xlu1 %v1277_v3, %s1427_s20  ;;  %v716_v42 = vmul.f32 0.5, %v1277_v3 }
 0xe82   :  { %v717_v43 = vadd.f32 0.5, %v716_v42 }
 0xe84   :  { %v718_v45 = vmul.f32 %v717_v43, %v632_v33 }
 0xef2   :  { %v721_v44 = vpop.permute.xlu1 %720 }
 0xef3   :  { %v723_v5 = vmul.f32 %v721_v44, %v717_v43 }
 0xef5   :  { %725 = vrot.lane.b32.xlu0 %v723_v5, %s1427_s20 }
 0xf67   :  { %v726_v6 = vpop.permute.xlu0 %725 }
 0xf68   :  { %v728_v46 = vadd.f32 %v726_v6, %v718_v45 }
 0xf6a   :  { %1278 = vtanh.f32 %v728_v46 }
 0xf77   :  { %v1279_v47 = vpop.eup %1278 }
 0xf78   :  { %731 = vrot.lane.b32.xlu1 %v1279_v47, %s1427_s20 }
 0xfea   :  { %v732_v9 = vpop.permute.xlu1 %731 }
 0xfeb   :  { %v734_v48 = vmul.f32 %v732_v9, %v717_v43 }
 0xfed   :  { %737 = vrot.lane.b32.xlu0 %v734_v48, %s1428_s23 }
0x105f   :  { %v738_v49 = vpop.permute.xlu0 %737 }
0x1060   :  { %1219 = vmatmul.mubr.msk.f32.vlgmr.msra.gmra.mxu1 %vm78_vm1, %v738_v49 }
0x1061   :  { %1240 = vmatprep.mubr.msk.f32.mxu1 %vm1426_vm0, %v1425_v0  ;;  %1233 = vmatpush3.msra.mxu1 %v931_v19 }
0x1062   :  { %1234 = vmatprep.subr.mxu1 %v1425_v0 }
0x1063   :  { %1235 = vmatpush3.msra.mxu1 %v930_v20 }
0x1064   :  { %1236 = vmatprep.subr.mxu1 %v1425_v0 }
0x1065   :  { %1237 = vmatpush3.msra.mxu1 %v929_v21 }
0x1066   :  { %1238 = vmatprep.subr.mxu1 %v1425_v0 }
0x1067   :  { %1239 = vmatpush3.msra.mxu1 %v928_v22 }
0x1120   :  { %v807_v51 = vpop.f32.mrf.mxu1 }
0x1121   :  { %v808_v52 = vadd.f32 %v807_v51, %v735_v50 }
0x1122   :  { %v1220_v53 = vpop.f32.mrf.mxu1 }
0x1123   :  { %1280 = vtanh.f32 %v808_v52 }
0x1130   :  { %v1281_v54 = vpop.eup %1280 }
0x1131   :  { %816 = vrot.lane.b32.xlu1 %v1281_v54, %s1427_s20  ;;  %v812_v55 = vmul.f32 0.5, %v1281_v54 }
0x1133   :  { %v813_v56 = vadd.f32 0.5, %v812_v55 }
0x1135   :  { %v814_v59 = vmul.f32 %v813_v56, %v728_v46 }
0x11a3   :  { %v817_v57 = vpop.permute.xlu1 %816 }
0x11a4   :  { %v819_v58 = vmul.f32 %v817_v57, %v813_v56 }
0x11a6   :  { %821 = vrot.lane.b32.xlu0 %v819_v58, %s1427_s20 }
0x1218   :  { %v822_v60 = vpop.permute.xlu0 %821 }
0x1219   :  { %v824_v61 = vadd.f32 %v822_v60, %v814_v59 }
0x121b   :  { %1282 = vtanh.f32 %v824_v61 }
0x1228   :  { %v1283_v62 = vpop.eup %1282 }
0x1229   :  { %827 = vrot.lane.b32.xlu1 %v1283_v62, %s1427_s20 }
0x129b   :  { %v828_v63 = vpop.permute.xlu1 %827 }
0x129c   :  { %v830_v1 = vmul.f32 %v828_v63, %v813_v56 }
0x129e   :  { %833 = vrot.lane.b32.xlu0 %v830_v1, %s1428_s23 }
0x1310   :  { %v834_v2 = vpop.permute.xlu0 %833 }
0x1311   :  { %1230 = vmatmul.mubr.msk.f32.vlgmr.msra.gmra.mxu0 %vm78_vm1, %v834_v2 }
0x13d1   :  { %v903_v7 = vpop.f32.mrf.mxu0 }
0x13d2   :  { %v904_v8 = vadd.f32 %v903_v7, %v831_v4 }
0x13d3   :  { %v1231_v10 = vpop.f32.mrf.mxu0 }
0x13d4   :  { %1284 = vtanh.f32 %v904_v8 }
0x13e1   :  { %v1285_v11 = vpop.eup %1284 }
0x13e2   :  { %912 = vrot.lane.b32.xlu1 %v1285_v11, %s1427_s20  ;;  %v908_v12 = vmul.f32 0.5, %v1285_v11 }
0x13e4   :  { %v909_v13 = vadd.f32 0.5, %v908_v12 }
0x13e6   :  { %v910_v16 = vmul.f32 %v909_v13, %v824_v61 }
0x1454   :  { %v913_v14 = vpop.permute.xlu1 %912 }
0x1455   :  { %v915_v15 = vmul.f32 %v913_v14, %v909_v13 }
0x1457   :  { %917 = vrot.lane.b32.xlu0 %v915_v15, %s1427_s20 }
0x14c9   :  { %v918_v17 = vpop.permute.xlu0 %917 }
0x14ca   :  { %v920_v18 = vadd.f32 %v918_v17, %v910_v16 }
0x14cc   :  { %1286 = vtanh.f32 %v920_v18 }
0x14d9   :  { %v1287_v23 = vpop.eup %1286 }
0x14da   :  { %923 = vrot.lane.b32.xlu1 %v1287_v23, %s1427_s20 }
0x154c   :  { %v924_v24 = vpop.permute.xlu1 %923 }
0x154d   :  { %v926_v25 = vmul.f32 %v924_v24, %v909_v13 }
0x154f   :  { %933 = vrot.lane.b32.xlu0 %v926_v25, %s1428_s23 }
0x15c1   :  { %v934_v26 = vpop.permute.xlu0 %933 }
0x15c2   :  { %1241 = vmatmul.mubr.msk.f32.vlgmr.msra.gmra.mxu1 %vm78_vm1, %v934_v26  ;;  %1023 = vst.msk [vmem:[#allocation10] sm:$0x1] %vm1022_vm2, %v934_v26 }
0x1682   :  { %v1003_v28 = vpop.f32.mrf.mxu1 }
0x1683   :  { %v1004_v0 = vadd.f32 %v1003_v28, %v927_v27 }
0x1684   :  { %v1242_v29 = vpop.f32.mrf.mxu1 }
0x1685   :  { %v1008_v30 = vsel %vm1007_vm3, %v1004_v0, -inf }
0x1686   :  { %1009 = vmax.xlane.f32.xlu1 %v1008_v30 }
0x170f   :  { %v1010_v31 = vpop.xlane.xlu1 %1009 }
0x1710   :  { %v1011_v32 = vsub.f32 %v1004_v0, %v1010_v31 }
0x1712   :  { %v1012_v33 = vmul.f32 1.442695, %v1011_v32 }
0x1714   :  { %1288 = vpow2.f32 %v1012_v33 }
0x1721   :  { %v1289_v34 = vpop.eup %1288 }
0x1722   :  { %v1014_v35 = vsel %vm1007_vm3, %v1289_v34, 0.0 }
0x1723   :  { %1015 = vadd.xlane.f32.xlu0 %v1014_v35 }
0x1739   :  { %1025 = vrot.lane.b32.xlu0 %v920_v18, %s1429_s26 }
0x173a   :  { %1363 = shalt.err (!%p1360_p5)
}
0x173b   :  { %1048 = dma.vmem_to_hbm [thread:$0]  %s1046_s28, 16, %s1657_s6, [#allocation11]  }
0x173c   :  { %s1431_s9 = smov [#allocation12]  }
0x173d   :  { %s1055_s10 = sshll.u32 %s1431_s9, 4  ;;  %s1056_s10 = int_to_ptr.vmem [resolvable:$true] %s1055_s10 }
0x173e   :  { %s1372_s11 = scalar_lea.vmem %s1056_s10, 16  ;;  %s1376_s12 = scalar_lea.vmem %s1056_s10, 32 }
0x173f   :  { %p1373_p6 = scmp.ne.s32.totalorder %s1056_s10, %s1372_s11  ;;  %p1377_p7 = scmp.lt.s32.totalorder %s1056_s10, %s1056_s10 }
0x1740   :  { %p1378_p8 = scmp.lt.s32.totalorder %s1376_s12, %s1372_s11 }
0x1742   :  { %p1379_p9 = por %p1378_p8, %p1377_p7 }
0x1744   :  { %p1380_p10 = pnand %p1379_p9, %p1373_p6 }
0x17ac   :  { %v1016_v36 = vpop.xlane.xlu0 %1015 }
0x17ad   :  { %1290 = vlog2.f32 %v1016_v36 }
0x17b0   :  { %v1026_v37 = vpop.permute.xlu0 %1025 }
0x17b1   :  { %1028 = vst.msk [vmem:[#allocation12] sm:$0x1] %vm1022_vm2, %v1026_v37 }
0x17b2   :  { %1383 = shalt.err (!%p1380_p10)
}
0x17b3   :  { %1058 = dma.vmem_to_hbm [thread:$0]  %s1056_s10, 16, %s1658_s7, [#allocation11]  }
0x17b4   :  { %s1432_s6 = smov [#allocation9]  }
0x17b5   :  { %s1035_s15 = sshll.u32 %s1432_s6, 4  ;;  %s1036_s15 = int_to_ptr.vmem [resolvable:$true] %s1035_s15 }
0x17b6   :  { %s1392_s2 = scalar_lea.vmem %s1036_s15, 16  ;;  %s1396_s16 = scalar_lea.vmem %s1036_s15, 32 }
0x17b7   :  { %p1393_p11 = scmp.ne.s32.totalorder %s1036_s15, %s1392_s2  ;;  %p1397_p12 = scmp.lt.s32.totalorder %s1036_s15, %s1036_s15 }
0x17b8   :  { %p1398_p13 = scmp.lt.s32.totalorder %s1396_s16, %s1392_s2 }
0x17ba   :  { %v1291_v38 = vpop.eup %1290  ;;  %p1399_p0 = por %p1398_p13, %p1397_p12 }
0x17bb   :  { %v1018_v39 = vmul.f32 0.6931472, %v1291_v38 }
0x17bc   :  { %p1400_p1 = pnand %p1399_p0, %p1393_p11 }
0x17bd   :  { %v1019_v40 = vsub.f32 %v1011_v32, %v1018_v39 }
0x17bf   :  { %1020 = vst [vmem:[#allocation9] sm:$0x1] %v1019_v40 }
0x17c0   :  { %1403 = shalt.err (!%p1400_p1)
}
0x17c1   :  { %1038 = dma.vmem_to_hbm [thread:$0]  %s1036_s15, 16, %s1656_s5, [#allocation5]  }
0x17c2   :  { %1416 = dma.done.wait [#allocation5], 16  }
0x17c3   :  { %1417 = vsyncadd [#allocation5], 4294967280 }
0x17c4   :  { %1418 = dma.done.wait [#allocation11], 32  }
0x17c5   :  { %1419 = vsyncadd [#allocation11], 4294967264 }
0x17c6   :  { %1068 = vsyncpa [#allocation4], 1 }
0x17c7   :  { %1069 = vsyncpa [#allocation7], 1 }
0x17c8   :  { %1070 = vsyncpa [#allocation5], 1 }
0x17c9   :  { %1071 = vsyncpa [#allocation11], 1 }

</bundles_post_ra>
